<compile_context>
chip_gen: v6e
topology: v6e:2x2x1
jax: 0.10.0
libtpu: 0.0.40
codegen_flags: <defaults>
</compile_context>

<pallas_src>
import functools

import numpy as np
import jax
import jax.numpy as jnp
from jax import lax
from jax.experimental import pallas as pl
from jax.experimental.pallas import tpu as pltpu

_LANE = 128
_SUB = 8


def _monitor_kernel(x_ref, c_ref, o_ref, *, n_valid, nt_split, ragged):
    sp = pl.program_id(1)          # core-split index
    ti = pl.program_id(2)          # voxel-tile index within the split
    gti = sp * nt_split + ti       # global voxel-tile index

    # Zero this (batch, split)'s resident accumulator block on its first tile.
    @pl.when(ti == 0)
    def _():
        o_ref[...] = jnp.zeros_like(o_ref)

    x = x_ref[0].astype(jnp.float32)   # (C, tile_r, 128) logits (f32 or bf16 in HBM)
    cls = c_ref[0]                     # (tile_r, 128) int32 class ids
    c_dim, tile_r, lanes = x.shape

    def fold(a):
        # (..., tile_r, 128) -> (..., 8, 128): sum groups of 8 rows.
        # Pure VPU vreg adds; keeps 8*128 partial sums for precision.
        lead = a.shape[:-2]
        return a.reshape(lead + (tile_r // _SUB, _SUB, lanes)).sum(axis=len(lead))

    def accumulate(apply_mask):
        if apply_mask:
            # Only the final (possibly out-of-range) tile pays for the mask.
            row = lax.broadcasted_iota(jnp.int32, (tile_r, lanes), 0)
            lane = lax.broadcasted_iota(jnp.int32, (tile_r, lanes), 1)
            flat = (gti * tile_r + row) * lanes + lane
            valid = flat < n_valid
            maskf = valid.astype(jnp.float32)
            xs = jnp.where(valid[None], x, 0.0)   # keep exp/log finite on pads
        else:
            maskf = None
            xs = x

        # One-hot rebuilt from class ids: cheap VPU compares, no HBM one-hot.
        c_iota = lax.broadcasted_iota(jnp.int32, (c_dim, tile_r, lanes), 0)
        t = (c_iota == cls[None]).astype(jnp.float32)

        # Softmax / log-softmax over the channel axis (axis 0, an untiled
        # major dim -> elementwise VPU/EUP work across C vreg slabs, no XLU).
        m = jnp.max(xs, axis=0, keepdims=True)
        e = jnp.exp(xs - m)
        s = jnp.sum(e, axis=0, keepdims=True)
        p = e * (1.0 / s)                  # one exact reciprocal per voxel
        lse = m + jnp.log(s)
        ce_vox = lse[0] - jnp.sum(t * xs, axis=0)

        if apply_mask:
            t = t * maskf[None]
            p = p * maskf[None]
            ce_vox = ce_vox * maskf

        # Accumulate lane-dense partial sums directly into the resident
        # output block: [0:C) intersection, [C:2C) pred sum, [2C:3C) target
        # sum, [3C] CE sum.
        o_ref[0, 0, 0:c_dim] += fold(p * t)
        o_ref[0, 0, c_dim:2 * c_dim] += fold(p)
        o_ref[0, 0, 2 * c_dim:3 * c_dim] += fold(t)
        o_ref[0, 0, 3 * c_dim] += fold(ce_vox)

    if ragged:
        tile_end = (gti + 1) * (tile_r * lanes)

        @pl.when(tile_end <= n_valid)
        def _():
            accumulate(False)

        @pl.when(tile_end > n_valid)
        def _():
            accumulate(True)
    else:
        accumulate(False)


def _vmem_capacity_bytes():
    try:
        return int(pltpu.get_tpu_info().vmem_capacity_bytes)
    except Exception:
        return 64 * 1024 * 1024   # conservative (v7x-sized) fallback


def monitoring_loss_from_classes(outputs, classes, smooth_nr=1e-5, smooth_dr=1e-5,
                                 tile_voxels=None, core_splits=None):
    """Returns (dice_loss, ce_loss). `classes` holds int class ids (N, *spatial)."""
    N, C = outputs.shape[0], outputs.shape[1]
    V = int(np.prod(outputs.shape[2:]))
    f32 = jnp.float32

    if core_splits is None:
        # Engage both TensorCores (v7x / megacore) when the batch axis alone
        # can't; on single-TC chips the extra "parallel" axis is near-free.
        core_splits = 2 if N == 1 else 1

    # Generation-aware budgets: bigger tiles where VMEM allows (v5e/v6e have
    # 128 MiB), conservative on v7x (64 MiB physical per TensorCore).
    big_vmem = _vmem_capacity_bytes() >= 128 * 1024 * 1024
    if tile_voxels is None:
        tile_voxels = (2048 if big_vmem else 1024) * _LANE
    vmem_limit = (64 if big_vmem else 48) * 1024 * 1024

    # ---- lane-dense voxel view: logits (N, C, R, 128), ids (N, R, 128) ----
    x = outputs.reshape(N, C, V)
    c = classes.reshape(N, V).astype(jnp.int32)
    blk = _SUB * _LANE
    if V % blk != 0:
        # Pad only up to the next multiple of 8*128; typical 3-D volumes
        # (D*H*W % 1024 == 0) skip this extra HBM pass entirely.
        Vp = ((V + blk - 1) // blk) * blk
        x = jnp.pad(x, ((0, 0), (0, 0), (0, Vp - V)))
        c = jnp.pad(c, ((0, 0), (0, Vp - V)))
    else:
        Vp = V
    R = Vp // _LANE                               # rows of 128 lanes (mult of 8)
    x = x.reshape(N, C, R, _LANE)
    c = c.reshape(N, R, _LANE)

    tile_r = max(_SUB, min(tile_voxels // _LANE, R))
    tile_r = max(_SUB, (tile_r // _SUB) * _SUB)   # multiple of 8
    nt_total = pl.cdiv(R, tile_r)                 # real voxel tiles
    splits = max(1, min(core_splits, nt_total))
    nt_split = pl.cdiv(nt_total, splits)
    # Any tile whose end voxel exceeds V (ragged last tile, padded rows, or a
    # clamped extra tile from the core split) runs the masked path.
    ragged = splits * nt_split * tile_r * _LANE > V
    S = 3 * C + 1

    def row_block(sp, ti):
        # Clamp so the auto-pipelined DMA always reads in-bounds rows; tiles
        # past nt_total contribute nothing (fully masked).
        return jnp.minimum(sp * nt_split + ti, nt_total - 1)

    kernel = functools.partial(_monitor_kernel, n_valid=V, nt_split=nt_split,
                               ragged=ragged)

    acc = pl.pallas_call(
        kernel,
        out_shape=jax.ShapeDtypeStruct((N, splits, S, _SUB, _LANE), f32),
        grid_spec=pltpu.PrefetchScalarGridSpec(
            num_scalar_prefetch=0,
            grid=(N, splits, nt_split),
            in_specs=[
                pl.BlockSpec((1, C, tile_r, _LANE),
                             lambda n, sp, ti: (n, 0, row_block(sp, ti), 0)),
                pl.BlockSpec((1, tile_r, _LANE),
                             lambda n, sp, ti: (n, row_block(sp, ti), 0)),
            ],
            out_specs=pl.BlockSpec((1, 1, S, _SUB, _LANE),
                                   lambda n, sp, ti: (n, sp, 0, 0, 0)),
        ),
        compiler_params=pltpu.CompilerParams(
            dimension_semantics=("parallel", "parallel", "arbitrary"),
            vmem_limit_bytes=vmem_limit,
        ),
    )(x, c)

    # Finish the cheap cross-lane / cross-split reduction in the wrapper.
    stats = acc.sum(axis=(1, 3, 4))               # (N, 3C+1)
    inter = stats[:, 0:C]
    po = stats[:, C:2 * C]
    go = stats[:, 2 * C:3 * C]
    ce_sum = stats[:, 3 * C]

    # MONAI DiceLoss(sigmoid=False, softmax=True, include_background=True),
    # default smooth_nr=smooth_dr=1e-5, reduction="mean" over batch & channel.
    dice = 1.0 - (2.0 * inter + smooth_nr) / (go + po + smooth_dr)
    dice_loss = jnp.mean(dice)

    # nn.CrossEntropyLoss default reduction="mean" over all N*D*H*W voxels.
    ce_loss = jnp.sum(ce_sum) / (N * V)
    return dice_loss, ce_loss


def monitoring_loss(outputs, target, smooth_nr=1e-5, smooth_dr=1e-5,
                    tile_voxels=None, core_splits=None):
    """MonitoringLoss.forward(outputs, target) with a one-hot `target`.

    Class ids are extracted once (one argmax pass) and streamed to the kernel
    instead of the 4x-larger one-hot f32 tensor. Exact for one-hot targets,
    which the reference's argmax(target) CE already requires.
    """
    classes = jnp.argmax(target, axis=1).astype(jnp.int32)
    return monitoring_loss_from_classes(outputs, classes, smooth_nr, smooth_dr,
                                        tile_voxels, core_splits)


def _reference_loss(outputs, target, smooth_nr=1e-5, smooth_dr=1e-5):
    red = tuple(range(2, outputs.ndim))
    p = jax.nn.softmax(outputs, axis=1)
    inter = jnp.sum(p * target, axis=red)
    po = jnp.sum(p, axis=red)
    go = jnp.sum(target, axis=red)
    dice_loss = jnp.mean(1.0 - (2.0 * inter + smooth_nr) / (go + po + smooth_dr))
    logp = jax.nn.log_softmax(outputs, axis=1)
    ce_loss = -jnp.mean(jnp.sum(target * logp, axis=1))
    return dice_loss, ce_loss


if __name__ == "__main__":
    key = jax.random.PRNGKey(0)
    k_logits, k_cls = jax.random.split(key)

    # Test 1: batch=2, classes=4, spatial 8^3 (V=512 -> pad-to-1024 + masked
    # single-tile path, batch-parallel grid).
    N, C, D, H, W = 2, 4, 8, 8, 8
    outputs = jax.random.normal(k_logits, (N, C, D, H, W), dtype=jnp.float32)
    classes = jax.random.randint(k_cls, (N, D, H, W), 0, C)
    target = jax.nn.one_hot(classes, C, axis=1, dtype=jnp.float32)

    dice_loss, ce_loss = jax.jit(monitoring_loss)(outputs, target)
    jax.block_until_ready((dice_loss, ce_loss))

    dice_ref, ce_ref = _reference_loss(outputs, target)
    assert np.allclose(np.asarray(dice_loss), np.asarray(dice_ref), rtol=1e-5, atol=1e-5)
    assert np.allclose(np.asarray(ce_loss), np.asarray(ce_ref), rtol=1e-5, atol=1e-5)

    # Test 2: batch=1, spatial 16^3 with a small forced tile -> multi-tile
    # accumulation with the two-way core split, no masking needed.
    k3, k4 = jax.random.split(k_cls)
    N2, C2, D2, H2, W2 = 1, 4, 16, 16, 16
    outputs2 = jax.random.normal(k3, (N2, C2, D2, H2, W2), dtype=jnp.float32)
    classes2 = jax.random.randint(k4, (N2, D2, H2, W2), 0, C2)
    target2 = jax.nn.one_hot(classes2, C2, axis=1, dtype=jnp.float32)

    loss_small_tiles = jax.jit(lambda o, t: monitoring_loss(o, t, tile_voxels=1024))
    dice2, ce2 = loss_small_tiles(outputs2, target2)
    jax.block_until_ready((dice2, ce2))

    dice2_ref, ce2_ref = _reference_loss(outputs2, target2)
    assert np.allclose(np.asarray(dice2), np.asarray(dice2_ref), rtol=1e-5, atol=1e-5)
    assert np.allclose(np.asarray(ce2), np.asarray(ce2_ref), rtol=1e-5, atol=1e-5)

    # Test 3: batch=1, spatial 16x16x12 (V=3072, 3 real tiles) with the 2-way
    # split -> exercises the clamped, fully-masked extra tile path.
    k5, k6 = jax.random.split(k4)
    N3, C3, D3, H3, W3 = 1, 4, 16, 16, 12
    outputs3 = jax.random.normal(k5, (N3, C3, D3, H3, W3), dtype=jnp.float32)
    classes3 = jax.random.randint(k6, (N3, D3, H3, W3), 0, C3)
    target3 = jax.nn.one_hot(classes3, C3, axis=1, dtype=jnp.float32)

    dice3, ce3 = loss_small_tiles(outputs3, target3)
    jax.block_until_ready((dice3, ce3))

    dice3_ref, ce3_ref = _reference_loss(outputs3, target3)
    assert np.allclose(np.asarray(dice3), np.asarray(dice3_ref), rtol=1e-5, atol=1e-5)
    assert np.allclose(np.asarray(ce3), np.asarray(ce3_ref), rtol=1e-5, atol=1e-5)

    print("KERNEL_OK")
</pallas_src>

<mosaic_0001>
module attributes {stable_mosaic.version = 11 : i64} {
  func.func @_monitor_kernel(%arg0: i32, %arg1: i32, %arg2: i32, %arg3: memref<1x4x8x128xf32, #tpu.memory_space<vmem>>, %arg4: memref<1x8x128xi32, #tpu.memory_space<vmem>>, %arg5: memref<1x1x13x8x128xf32, #tpu.memory_space<vmem>>) attributes {dimension_semantics = [#tpu.dimension_semantics<parallel>, #tpu.dimension_semantics<parallel>, #tpu.dimension_semantics<arbitrary>], iteration_bounds = array<i64: 2, 1, 1>, scalar_prefetch = 0 : i64, scratch_operands = 0 : i64, tpu.core_type = #tpu.core_type<tc>, window_params = [{transform_indices = @transform_0, window_bounds = array<i64: 1, 4, 8, 128>}, {transform_indices = @transform_1, window_bounds = array<i64: 1, 8, 128>}, {transform_indices = @transform_2, window_bounds = array<i64: 1, 1, 13, 8, 128>}]} {
    %c1_i32 = arith.constant 1 : i32
    %0 = arith.muli %arg1, %c1_i32 : i32
    %1 = arith.addi %0, %arg2 : i32
    %c0_i32 = arith.constant 0 : i32
    %2 = arith.cmpi eq, %arg2, %c0_i32 : i32
    %3 = arith.extui %2 : i1 to i32
    %c0_i32_0 = arith.constant 0 : i32
    %4 = arith.cmpi ne, %3, %c0_i32_0 : i32
    scf.if %4 {
      %cst = arith.constant 0.000000e+00 : f32
      %17 = vector.broadcast %cst : f32 to vector<1x1x13x8x128xf32>
      %c0_11 = arith.constant 0 : index
      %c0_12 = arith.constant 0 : index
      %c0_13 = arith.constant 0 : index
      %c0_14 = arith.constant 0 : index
      %c0_15 = arith.constant 0 : index
      %18 = vector.load %arg5[%c0_11, %c0_12, %c0_13, %c0_14, %c0_15] : memref<1x1x13x8x128xf32, #tpu.memory_space<vmem>>, vector<1x1x13x8x128xf32>
      tpu.vector_store %arg5[%c0_11, %c0_12, %c0_13, %c0_14, %c0_15], %17 {strides = array<i32>} : memref<1x1x13x8x128xf32, #tpu.memory_space<vmem>>, vector<1x1x13x8x128xf32>,
    } else {
    }
    %c0 = arith.constant 0 : index
    %c0_1 = arith.constant 0 : index
    %c0_2 = arith.constant 0 : index
    %c0_3 = arith.constant 0 : index
    %5 = vector.load %arg3[%c0, %c0_1, %c0_2, %c0_3] : memref<1x4x8x128xf32, #tpu.memory_space<vmem>>, vector<1x4x8x128xf32>
    %6 = vector.shape_cast %5 : vector<1x4x8x128xf32> to vector<4x8x128xf32>
    %c0_4 = arith.constant 0 : index
    %c0_5 = arith.constant 0 : index
    %c0_6 = arith.constant 0 : index
    %7 = vector.load %arg4[%c0_4, %c0_5, %c0_6] : memref<1x8x128xi32, #tpu.memory_space<vmem>>, vector<1x8x128xi32>
    %8 = vector.shape_cast %7 : vector<1x8x128xi32> to vector<8x128xi32>
    %c1_i32_7 = arith.constant 1 : i32
    %9 = arith.addi %1, %c1_i32_7 : i32
    %c1024_i32 = arith.constant 1024 : i32
    %10 = arith.muli %9, %c1024_i32 : i32
    %c512_i32 = arith.constant 512 : i32
    %11 = arith.cmpi sle, %10, %c512_i32 : i32
    %12 = arith.extui %11 : i1 to i32
    %c0_i32_8 = arith.constant 0 : i32
    %13 = arith.cmpi ne, %12, %c0_i32_8 : i32
    scf.if %13 {
      %17 = tpu.iota {dimensions = array<i32: 0>} : vector<4x8x128xi32>
      %18 = vector.shape_cast %8 : vector<8x128xi32> to vector<1x8x128xi32>
      %19 = vector.broadcast %18 : vector<1x8x128xi32> to vector<4x8x128xi32>
      %20 = arith.cmpi eq, %17, %19 : vector<4x8x128xi32>
      %21 = arith.extui %20 : vector<4x8x128xi1> to vector<4x8x128xi32>
      %22 = arith.sitofp %21 : vector<4x8x128xi32> to vector<4x8x128xf32>
      %cst = arith.constant dense<0xFF800000> : vector<8x128xf32>
      %23 = vector.multi_reduction <maximumf>, %6, %cst [0] : vector<4x8x128xf32> to vector<8x128xf32>
      %24 = vector.shape_cast %23 : vector<8x128xf32> to vector<1x8x128xf32>
      %25 = vector.broadcast %24 : vector<1x8x128xf32> to vector<4x8x128xf32>
      %26 = arith.subf %6, %25 : vector<4x8x128xf32>
      %27 = math.exp %26 : vector<4x8x128xf32>
      %cst_11 = arith.constant dense<0.000000e+00> : vector<8x128xf32>
      %28 = vector.multi_reduction <add>, %27, %cst_11 [0] : vector<4x8x128xf32> to vector<8x128xf32>
      %29 = vector.shape_cast %28 : vector<8x128xf32> to vector<1x8x128xf32>
      %cst_12 = arith.constant 1.000000e+00 : f32
      %30 = vector.broadcast %cst_12 : f32 to vector<1x8x128xf32>
      %31 = arith.divf %30, %29 : vector<1x8x128xf32>
      %32 = vector.broadcast %31 : vector<1x8x128xf32> to vector<4x8x128xf32>
      %33 = arith.mulf %27, %32 : vector<4x8x128xf32>
      %34 = math.log %29 : vector<1x8x128xf32>
      %35 = arith.addf %24, %34 : vector<1x8x128xf32>
      %36 = vector.shape_cast %35 : vector<1x8x128xf32> to vector<8x128xf32>
      %37 = arith.mulf %22, %6 : vector<4x8x128xf32>
      %cst_13 = arith.constant dense<0.000000e+00> : vector<8x128xf32>
      %38 = vector.multi_reduction <add>, %37, %cst_13 [0] : vector<4x8x128xf32> to vector<8x128xf32>
      %39 = arith.subf %36, %38 : vector<8x128xf32>
      %c0_14 = arith.constant 0 : index
      %c0_15 = arith.constant 0 : index
      %c0_16 = arith.constant 0 : index
      %c0_17 = arith.constant 0 : index
      %c0_18 = arith.constant 0 : index
      %40 = vector.load %arg5[%c0_14, %c0_15, %c0_16, %c0_17, %c0_18] : memref<1x1x13x8x128xf32, #tpu.memory_space<vmem>>, vector<1x1x4x8x128xf32>
      %41 = vector.shape_cast %40 : vector<1x1x4x8x128xf32> to vector<4x8x128xf32>
      %42 = arith.mulf %33, %22 : vector<4x8x128xf32>
      %43 = vector.shape_cast %42 : vector<4x8x128xf32> to vector<4x1x8x128xf32>
      %cst_19 = arith.constant dense<0.000000e+00> : vector<4x8x128xf32>
      %44 = vector.multi_reduction <add>, %43, %cst_19 [1] : vector<4x1x8x128xf32> to vector<4x8x128xf32>
      %45 = arith.addf %41, %44 : vector<4x8x128xf32>
      %c0_20 = arith.constant 0 : index
      %c0_21 = arith.constant 0 : index
      %c0_22 = arith.constant 0 : index
      %c0_23 = arith.constant 0 : index
      %c0_24 = arith.constant 0 : index
      %46 = vector.load %arg5[%c0_20, %c0_21, %c0_22, %c0_23, %c0_24] : memref<1x1x13x8x128xf32, #tpu.memory_space<vmem>>, vector<1x1x4x8x128xf32>
      %47 = vector.shape_cast %46 : vector<1x1x4x8x128xf32> to vector<4x8x128xf32>
      %48 = vector.shape_cast %45 : vector<4x8x128xf32> to vector<1x1x4x8x128xf32>
      tpu.vector_store %arg5[%c0_20, %c0_21, %c0_22, %c0_23, %c0_24], %48 {strides = array<i32>} : memref<1x1x13x8x128xf32, #tpu.memory_space<vmem>>, vector<1x1x4x8x128xf32>,
      %c0_25 = arith.constant 0 : index
      %c0_26 = arith.constant 0 : index
      %c4 = arith.constant 4 : index
      %c0_27 = arith.constant 0 : index
      %c0_28 = arith.constant 0 : index
      %49 = vector.load %arg5[%c0_25, %c0_26, %c4, %c0_27, %c0_28] : memref<1x1x13x8x128xf32, #tpu.memory_space<vmem>>, vector<1x1x4x8x128xf32>
      %50 = vector.shape_cast %49 : vector<1x1x4x8x128xf32> to vector<4x8x128xf32>
      %51 = vector.shape_cast %33 : vector<4x8x128xf32> to vector<4x1x8x128xf32>
      %cst_29 = arith.constant dense<0.000000e+00> : vector<4x8x128xf32>
      %52 = vector.multi_reduction <add>, %51, %cst_29 [1] : vector<4x1x8x128xf32> to vector<4x8x128xf32>
      %53 = arith.addf %50, %52 : vector<4x8x128xf32>
      %c0_30 = arith.constant 0 : index
      %c0_31 = arith.constant 0 : index
      %c4_32 = arith.constant 4 : index
      %c0_33 = arith.constant 0 : index
      %c0_34 = arith.constant 0 : index
      %54 = vector.load %arg5[%c0_30, %c0_31, %c4_32, %c0_33, %c0_34] : memref<1x1x13x8x128xf32, #tpu.memory_space<vmem>>, vector<1x1x4x8x128xf32>
      %55 = vector.shape_cast %54 : vector<1x1x4x8x128xf32> to vector<4x8x128xf32>
      %56 = vector.shape_cast %53 : vector<4x8x128xf32> to vector<1x1x4x8x128xf32>
      tpu.vector_store %arg5[%c0_30, %c0_31, %c4_32, %c0_33, %c0_34], %56 {strides = array<i32>} : memref<1x1x13x8x128xf32, #tpu.memory_space<vmem>>, vector<1x1x4x8x128xf32>,
      %c0_35 = arith.constant 0 : index
      %c0_36 = arith.constant 0 : index
      %c8 = arith.constant 8 : index
      %c0_37 = arith.constant 0 : index
      %c0_38 = arith.constant 0 : index
      %57 = vector.load %arg5[%c0_35, %c0_36, %c8, %c0_37, %c0_38] : memref<1x1x13x8x128xf32, #tpu.memory_space<vmem>>, vector<1x1x4x8x128xf32>
      %58 = vector.shape_cast %57 : vector<1x1x4x8x128xf32> to vector<4x8x128xf32>
      %59 = vector.shape_cast %22 : vector<4x8x128xf32> to vector<4x1x8x128xf32>
      %cst_39 = arith.constant dense<0.000000e+00> : vector<4x8x128xf32>
      %60 = vector.multi_reduction <add>, %59, %cst_39 [1] : vector<4x1x8x128xf32> to vector<4x8x128xf32>
      %61 = arith.addf %58, %60 : vector<4x8x128xf32>
      %c0_40 = arith.constant 0 : index
      %c0_41 = arith.constant 0 : index
      %c8_42 = arith.constant 8 : index
      %c0_43 = arith.constant 0 : index
      %c0_44 = arith.constant 0 : index
      %62 = vector.load %arg5[%c0_40, %c0_41, %c8_42, %c0_43, %c0_44] : memref<1x1x13x8x128xf32, #tpu.memory_space<vmem>>, vector<1x1x4x8x128xf32>
      %63 = vector.shape_cast %62 : vector<1x1x4x8x128xf32> to vector<4x8x128xf32>
      %64 = vector.shape_cast %61 : vector<4x8x128xf32> to vector<1x1x4x8x128xf32>
      tpu.vector_store %arg5[%c0_40, %c0_41, %c8_42, %c0_43, %c0_44], %64 {strides = array<i32>} : memref<1x1x13x8x128xf32, #tpu.memory_space<vmem>>, vector<1x1x4x8x128xf32>,
      %c0_45 = arith.constant 0 : index
      %c0_46 = arith.constant 0 : index
      %c12 = arith.constant 12 : index
      %c0_47 = arith.constant 0 : index
      %c0_48 = arith.constant 0 : index
      %65 = vector.load %arg5[%c0_45, %c0_46, %c12, %c0_47, %c0_48] : memref<1x1x13x8x128xf32, #tpu.memory_space<vmem>>, vector<1x1x1x8x128xf32>
      %66 = vector.shape_cast %65 : vector<1x1x1x8x128xf32> to vector<8x128xf32>
      %67 = vector.shape_cast %39 : vector<8x128xf32> to vector<1x8x128xf32>
      %cst_49 = arith.constant dense<0.000000e+00> : vector<8x128xf32>
      %68 = vector.multi_reduction <add>, %67, %cst_49 [0] : vector<1x8x128xf32> to vector<8x128xf32>
      %69 = arith.addf %66, %68 : vector<8x128xf32>
      %c0_50 = arith.constant 0 : index
      %c0_51 = arith.constant 0 : index
      %c12_52 = arith.constant 12 : index
      %c0_53 = arith.constant 0 : index
      %c0_54 = arith.constant 0 : index
      %70 = vector.load %arg5[%c0_50, %c0_51, %c12_52, %c0_53, %c0_54] : memref<1x1x13x8x128xf32, #tpu.memory_space<vmem>>, vector<1x1x1x8x128xf32>
      %71 = vector.shape_cast %70 : vector<1x1x1x8x128xf32> to vector<8x128xf32>
      %72 = vector.shape_cast %69 : vector<8x128xf32> to vector<1x1x1x8x128xf32>
      tpu.vector_store %arg5[%c0_50, %c0_51, %c12_52, %c0_53, %c0_54], %72 {strides = array<i32>} : memref<1x1x13x8x128xf32, #tpu.memory_space<vmem>>, vector<1x1x1x8x128xf32>,
    } else {
    }
    %c512_i32_9 = arith.constant 512 : i32
    %14 = arith.cmpi sgt, %10, %c512_i32_9 : i32
    %15 = arith.extui %14 : i1 to i32
    %c0_i32_10 = arith.constant 0 : i32
    %16 = arith.cmpi ne, %15, %c0_i32_10 : i32
    scf.if %16 {
      %17 = tpu.iota {dimensions = array<i32: 0>} : vector<8x128xi32>
      %18 = tpu.iota {dimensions = array<i32: 1>} : vector<8x128xi32>
      %c8_i32 = arith.constant 8 : i32
      %19 = arith.muli %1, %c8_i32 : i32
      %20 = vector.broadcast %19 : i32 to vector<8x128xi32>
      %21 = arith.addi %20, %17 : vector<8x128xi32>
      %c128_i32 = arith.constant 128 : i32
      %22 = vector.broadcast %c128_i32 : i32 to vector<8x128xi32>
      %23 = arith.muli %21, %22 : vector<8x128xi32>
      %24 = arith.addi %23, %18 : vector<8x128xi32>
      %c512_i32_11 = arith.constant 512 : i32
      %25 = vector.broadcast %c512_i32_11 : i32 to vector<8x128xi32>
      %26 = arith.cmpi slt, %24, %25 : vector<8x128xi32>
      %27 = arith.extui %26 : vector<8x128xi1> to vector<8x128xi32>
      %28 = arith.sitofp %27 : vector<8x128xi32> to vector<8x128xf32>
      %29 = vector.shape_cast %26 : vector<8x128xi1> to vector<1x8x128xi1>
      %cst = arith.constant 0.000000e+00 : f32
      %30 = vector.shape_cast %29 : vector<1x8x128xi1> to vector<1x8x128xi1>
      %31 = vector.broadcast %30 : vector<1x8x128xi1> to vector<4x8x128xi1>
      %32 = vector.broadcast %cst : f32 to vector<4x8x128xf32>
      %33 = arith.select %31, %6, %32 : vector<4x8x128xi1>, vector<4x8x128xf32>
      %34 = tpu.iota {dimensions = array<i32: 0>} : vector<4x8x128xi32>
      %35 = vector.shape_cast %8 : vector<8x128xi32> to vector<1x8x128xi32>
      %36 = vector.broadcast %35 : vector<1x8x128xi32> to vector<4x8x128xi32>
      %37 = arith.cmpi eq, %34, %36 : vector<4x8x128xi32>
      %38 = arith.extui %37 : vector<4x8x128xi1> to vector<4x8x128xi32>
      %39 = arith.sitofp %38 : vector<4x8x128xi32> to vector<4x8x128xf32>
      %cst_12 = arith.constant dense<0xFF800000> : vector<8x128xf32>
      %40 = vector.multi_reduction <maximumf>, %33, %cst_12 [0] : vector<4x8x128xf32> to vector<8x128xf32>
      %41 = vector.shape_cast %40 : vector<8x128xf32> to vector<1x8x128xf32>
      %42 = vector.broadcast %41 : vector<1x8x128xf32> to vector<4x8x128xf32>
      %43 = arith.subf %33, %42 : vector<4x8x128xf32>
      %44 = math.exp %43 : vector<4x8x128xf32>
      %cst_13 = arith.constant dense<0.000000e+00> : vector<8x128xf32>
      %45 = vector.multi_reduction <add>, %44, %cst_13 [0] : vector<4x8x128xf32> to vector<8x128xf32>
      %46 = vector.shape_cast %45 : vector<8x128xf32> to vector<1x8x128xf32>
      %cst_14 = arith.constant 1.000000e+00 : f32
      %47 = vector.broadcast %cst_14 : f32 to vector<1x8x128xf32>
      %48 = arith.divf %47, %46 : vector<1x8x128xf32>
      %49 = vector.broadcast %48 : vector<1x8x128xf32> to vector<4x8x128xf32>
      %50 = arith.mulf %44, %49 : vector<4x8x128xf32>
      %51 = math.log %46 : vector<1x8x128xf32>
      %52 = arith.addf %41, %51 : vector<1x8x128xf32>
      %53 = vector.shape_cast %52 : vector<1x8x128xf32> to vector<8x128xf32>
      %54 = arith.mulf %39, %33 : vector<4x8x128xf32>
      %cst_15 = arith.constant dense<0.000000e+00> : vector<8x128xf32>
      %55 = vector.multi_reduction <add>, %54, %cst_15 [0] : vector<4x8x128xf32> to vector<8x128xf32>
      %56 = arith.subf %53, %55 : vector<8x128xf32>
      %57 = vector.shape_cast %28 : vector<8x128xf32> to vector<1x8x128xf32>
      %58 = vector.broadcast %57 : vector<1x8x128xf32> to vector<4x8x128xf32>
      %59 = arith.mulf %39, %58 : vector<4x8x128xf32>
      %60 = vector.shape_cast %28 : vector<8x128xf32> to vector<1x8x128xf32>
      %61 = vector.broadcast %60 : vector<1x8x128xf32> to vector<4x8x128xf32>
      %62 = arith.mulf %50, %61 : vector<4x8x128xf32>
      %63 = arith.mulf %56, %28 : vector<8x128xf32>
      %c0_16 = arith.constant 0 : index
      %c0_17 = arith.constant 0 : index
      %c0_18 = arith.constant 0 : index
      %c0_19 = arith.constant 0 : index
      %c0_20 = arith.constant 0 : index
      %64 = vector.load %arg5[%c0_16, %c0_17, %c0_18, %c0_19, %c0_20] : memref<1x1x13x8x128xf32, #tpu.memory_space<vmem>>, vector<1x1x4x8x128xf32>
      %65 = vector.shape_cast %64 : vector<1x1x4x8x128xf32> to vector<4x8x128xf32>
      %66 = arith.mulf %62, %59 : vector<4x8x128xf32>
      %67 = vector.shape_cast %66 : vector<4x8x128xf32> to vector<4x1x8x128xf32>
      %cst_21 = arith.constant dense<0.000000e+00> : vector<4x8x128xf32>
      %68 = vector.multi_reduction <add>, %67, %cst_21 [1] : vector<4x1x8x128xf32> to vector<4x8x128xf32>
      %69 = arith.addf %65, %68 : vector<4x8x128xf32>
      %c0_22 = arith.constant 0 : index
      %c0_23 = arith.constant 0 : index
      %c0_24 = arith.constant 0 : index
      %c0_25 = arith.constant 0 : index
      %c0_26 = arith.constant 0 : index
      %70 = vector.load %arg5[%c0_22, %c0_23, %c0_24, %c0_25, %c0_26] : memref<1x1x13x8x128xf32, #tpu.memory_space<vmem>>, vector<1x1x4x8x128xf32>
      %71 = vector.shape_cast %70 : vector<1x1x4x8x128xf32> to vector<4x8x128xf32>
      %72 = vector.shape_cast %69 : vector<4x8x128xf32> to vector<1x1x4x8x128xf32>
      tpu.vector_store %arg5[%c0_22, %c0_23, %c0_24, %c0_25, %c0_26], %72 {strides = array<i32>} : memref<1x1x13x8x128xf32, #tpu.memory_space<vmem>>, vector<1x1x4x8x128xf32>,
      %c0_27 = arith.constant 0 : index
      %c0_28 = arith.constant 0 : index
      %c4 = arith.constant 4 : index
      %c0_29 = arith.constant 0 : index
      %c0_30 = arith.constant 0 : index
      %73 = vector.load %arg5[%c0_27, %c0_28, %c4, %c0_29, %c0_30] : memref<1x1x13x8x128xf32, #tpu.memory_space<vmem>>, vector<1x1x4x8x128xf32>
      %74 = vector.shape_cast %73 : vector<1x1x4x8x128xf32> to vector<4x8x128xf32>
      %75 = vector.shape_cast %62 : vector<4x8x128xf32> to vector<4x1x8x128xf32>
      %cst_31 = arith.constant dense<0.000000e+00> : vector<4x8x128xf32>
      %76 = vector.multi_reduction <add>, %75, %cst_31 [1] : vector<4x1x8x128xf32> to vector<4x8x128xf32>
      %77 = arith.addf %74, %76 : vector<4x8x128xf32>
      %c0_32 = arith.constant 0 : index
      %c0_33 = arith.constant 0 : index
      %c4_34 = arith.constant 4 : index
      %c0_35 = arith.constant 0 : index
      %c0_36 = arith.constant 0 : index
      %78 = vector.load %arg5[%c0_32, %c0_33, %c4_34, %c0_35, %c0_36] : memref<1x1x13x8x128xf32, #tpu.memory_space<vmem>>, vector<1x1x4x8x128xf32>
      %79 = vector.shape_cast %78 : vector<1x1x4x8x128xf32> to vector<4x8x128xf32>
      %80 = vector.shape_cast %77 : vector<4x8x128xf32> to vector<1x1x4x8x128xf32>
      tpu.vector_store %arg5[%c0_32, %c0_33, %c4_34, %c0_35, %c0_36], %80 {strides = array<i32>} : memref<1x1x13x8x128xf32, #tpu.memory_space<vmem>>, vector<1x1x4x8x128xf32>,
      %c0_37 = arith.constant 0 : index
      %c0_38 = arith.constant 0 : index
      %c8 = arith.constant 8 : index
      %c0_39 = arith.constant 0 : index
      %c0_40 = arith.constant 0 : index
      %81 = vector.load %arg5[%c0_37, %c0_38, %c8, %c0_39, %c0_40] : memref<1x1x13x8x128xf32, #tpu.memory_space<vmem>>, vector<1x1x4x8x128xf32>
      %82 = vector.shape_cast %81 : vector<1x1x4x8x128xf32> to vector<4x8x128xf32>
      %83 = vector.shape_cast %59 : vector<4x8x128xf32> to vector<4x1x8x128xf32>
      %cst_41 = arith.constant dense<0.000000e+00> : vector<4x8x128xf32>
      %84 = vector.multi_reduction <add>, %83, %cst_41 [1] : vector<4x1x8x128xf32> to vector<4x8x128xf32>
      %85 = arith.addf %82, %84 : vector<4x8x128xf32>
      %c0_42 = arith.constant 0 : index
      %c0_43 = arith.constant 0 : index
      %c8_44 = arith.constant 8 : index
      %c0_45 = arith.constant 0 : index
      %c0_46 = arith.constant 0 : index
      %86 = vector.load %arg5[%c0_42, %c0_43, %c8_44, %c0_45, %c0_46] : memref<1x1x13x8x128xf32, #tpu.memory_space<vmem>>, vector<1x1x4x8x128xf32>
      %87 = vector.shape_cast %86 : vector<1x1x4x8x128xf32> to vector<4x8x128xf32>
      %88 = vector.shape_cast %85 : vector<4x8x128xf32> to vector<1x1x4x8x128xf32>
      tpu.vector_store %arg5[%c0_42, %c0_43, %c8_44, %c0_45, %c0_46], %88 {strides = array<i32>} : memref<1x1x13x8x128xf32, #tpu.memory_space<vmem>>, vector<1x1x4x8x128xf32>,
      %c0_47 = arith.constant 0 : index
      %c0_48 = arith.constant 0 : index
      %c12 = arith.constant 12 : index
      %c0_49 = arith.constant 0 : index
      %c0_50 = arith.constant 0 : index
      %89 = vector.load %arg5[%c0_47, %c0_48, %c12, %c0_49, %c0_50] : memref<1x1x13x8x128xf32, #tpu.memory_space<vmem>>, vector<1x1x1x8x128xf32>
      %90 = vector.shape_cast %89 : vector<1x1x1x8x128xf32> to vector<8x128xf32>
      %91 = vector.shape_cast %63 : vector<8x128xf32> to vector<1x8x128xf32>
      %cst_51 = arith.constant dense<0.000000e+00> : vector<8x128xf32>
      %92 = vector.multi_reduction <add>, %91, %cst_51 [0] : vector<1x8x128xf32> to vector<8x128xf32>
      %93 = arith.addf %90, %92 : vector<8x128xf32>
      %c0_52 = arith.constant 0 : index
      %c0_53 = arith.constant 0 : index
      %c12_54 = arith.constant 12 : index
      %c0_55 = arith.constant 0 : index
      %c0_56 = arith.constant 0 : index
      %94 = vector.load %arg5[%c0_52, %c0_53, %c12_54, %c0_55, %c0_56] : memref<1x1x13x8x128xf32, #tpu.memory_space<vmem>>, vector<1x1x1x8x128xf32>
      %95 = vector.shape_cast %94 : vector<1x1x1x8x128xf32> to vector<8x128xf32>
      %96 = vector.shape_cast %93 : vector<8x128xf32> to vector<1x1x1x8x128xf32>
      tpu.vector_store %arg5[%c0_52, %c0_53, %c12_54, %c0_55, %c0_56], %96 {strides = array<i32>} : memref<1x1x13x8x128xf32, #tpu.memory_space<vmem>>, vector<1x1x1x8x128xf32>,
    } else {
    }
    return
  }
  func.func @transform_0(%arg0: i32, %arg1: i32, %arg2: i32) -> (i32, i32, i32, i32) {
    %c1_i32 = arith.constant 1 : i32
    %0 = arith.muli %arg1, %c1_i32 : i32
    %1 = arith.addi %0, %arg2 : i32
    %c0_i32 = arith.constant 0 : i32
    %2 = arith.minsi %1, %c0_i32 : i32
    %c0_i32_0 = arith.constant 0 : i32
    %c0_i32_1 = arith.constant 0 : i32
    %c0_i32_2 = arith.constant 0 : i32
    return %arg0, %c0_i32_0, %2, %c0_i32_1 : i32, i32, i32, i32
  }
  func.func @transform_1(%arg0: i32, %arg1: i32, %arg2: i32) -> (i32, i32, i32) {
    %c1_i32 = arith.constant 1 : i32
    %0 = arith.muli %arg1, %c1_i32 : i32
    %1 = arith.addi %0, %arg2 : i32
    %c0_i32 = arith.constant 0 : i32
    %2 = arith.minsi %1, %c0_i32 : i32
    %c0_i32_0 = arith.constant 0 : i32
    %c0_i32_1 = arith.constant 0 : i32
    return %arg0, %2, %c0_i32_0 : i32, i32, i32
  }
  func.func @transform_2(%arg0: i32, %arg1: i32, %arg2: i32) -> (i32, i32, i32, i32, i32) {
    %c0_i32 = arith.constant 0 : i32
    %c0_i32_0 = arith.constant 0 : i32
    %c0_i32_1 = arith.constant 0 : i32
    %c0_i32_2 = arith.constant 0 : i32
    return %arg0, %arg1, %c0_i32, %c0_i32_0, %c0_i32_1 : i32, i32, i32, i32, i32
  }
}

</mosaic_0001>

<bundles_post_ra>
// kernel: monitoring_loss.1
= control target key start
LH: loop header
LB: loop body
LE: loop exit
PB: predicated region body
PF: predicated region fallthrough
CT: control target
= control target key end

     0   :  { %s767_s9 = smov 0   ;;  %s769_s10 = smov 0   ;;  %s834_s0 = inlined_call_operand.vmem [shape: f32[2,4,8,128], index: 0, kind: input, shape index: {}]   ;;  %s835_s1 = inlined_call_operand.vmem [shape: s32[2,8,128], index: 1, kind: input, shape index: {}]   ;;  %s836_s2 = inlined_call_operand.vmem [shape: f32[2,1,13,8,128], index: 2, kind: output, shape index: {}]  }
   0x1   :  { %s771_s11 = smov 0  }
   0x2 LB: > { %s31_s12 = sadd.s32 1, %s745_s10  ;;  %p636_p0 = scmp.ge.s32.totalorder %s749_s11, 1  ;;  %s749_s11 = sphi %s771_s11, %s12_s11   ;;  %s745_s10 = sphi %s769_s10, %s838_s10   ;;  %s741_s9 = sphi %s767_s9, %s837_s9  }
   0x3   : > { %p33_p1 = scmp.ge.s32.totalorder %s31_s12, 2  ;;  %p176_p2 = scmp.lt.s32.totalorder %s749_s11, 3 }
   0x5   : > { %s840_s12 = smov (%p33_p1, %s31_s12), 0  ;;  %p177_p3 = pnand %p636_p0, %p176_p2 }
   0x6   : > { %p221_p4 = scmp.lt.s32.totalorder (!%p177_p3), %s741_s9, 1 }
   0x7   : > { %180 = sbr.rel (%p177_p3) target bundleno = 76 (0x4c), region = 28 }
   0xc   : > { %v393_v0 = vlaneseq  ;;  %s842_s9 = smov (!%p221_p4, %s741_s9), 1  ;;  %v751_v10 = vmov 0.0  }
   0xd   : > { %s688_s13 = sshll.u32 %s842_s9, 5  ;;  %s639_s17 = sshll.u32 %s842_s9, 3 }
   0xe   : > { %v394_v1 = vshrl.u32 %v393_v0, 7  ;;  %v396_v2 = vand.u32 127, %v393_v0  ;;  %s228_s16 = scalar_lea.vmem %s834_s0, %s688_s13  ;;  %s241_s20 = scalar_lea.vmem %s835_s1, %s639_s17 }
   0xf   : > { %v272_v4 = vld [vmem:[%s228_s16] sm:$0xff]  ;;  %v273_v5 = vld [vmem:[%s228_s16 + $0x8] sm:$0xff]  ;;  %v274_v6 = vld [vmem:[%s228_s16 + $0x10] sm:$0xff]  ;;  %s689_s21 = smul.u32 104, %s842_s9 }
  0x10   : > { %v400_v3 = vmul.u32 128, %v394_v1  ;;  %v275_v8 = vld [vmem:[%s228_s16 + $0x18] sm:$0xff]  ;;  %v276_v9 = vld [vmem:[%s241_s20] sm:$0xff] }
  0x11   : > { %vm410_vm1 = vcmp.eq.s32.totalorder %v276_v9, 0  ;;  %vm411_vm2 = vcmp.eq.s32.totalorder %v276_v9, 1  ;;  %vm412_vm3 = vcmp.eq.s32.totalorder %v276_v9, 2  ;;  %vm413_vm4 = vcmp.eq.s32.totalorder %v276_v9, 3  ;;  %s803_s24 = scalar_lea.vmem %s836_s2, %s689_s21 }
  0x12   : > { %v401_v7 = vadd.s32 %v400_v3, %v396_v2  ;;  %v664_v17 = vsel %vm410_vm1, 1.0, %v751_v10  ;;  %v665_v19 = vsel %vm411_vm2, 1.0, %v751_v10  ;;  %v666_v23 = vsel %vm412_vm3, 1.0, %v751_v10 }
  0x13   : > { %v667_v25 = vsel %vm413_vm4, 1.0, %v751_v10 }
  0x14   : > { %vm402_vm0 = vcmp.lt.s32.totalorder %v401_v7, 512 }
  0x15   : > { %v796_v11 = vsel %vm402_vm0, 1.0, %v751_v10  ;;  %v406_v12 = vsel %vm402_vm0, %v272_v4, 0.0  ;;  %v407_v13 = vsel %vm402_vm0, %v273_v5, 0.0  ;;  %v408_v14 = vsel %vm402_vm0, %v274_v6, 0.0 }
  0x16   : > { %v409_v15 = vsel %vm402_vm0, %v275_v8, 0.0  ;;  %v422_v16 = vmax.f32 %v406_v12, %v407_v13  ;;  %v457_v20 = vmul.f32 %v664_v17, %v796_v11  ;;  %v458_v21 = vmul.f32 %v665_v19, %v796_v11 }
  0x17   : > { %v423_v18 = vmax.f32 %v408_v14, %v409_v15  ;;  %v459_v24 = vmul.f32 %v666_v23, %v796_v11  ;;  %v460_v30 = vmul.f32 %v667_v25, %v796_v11  ;;  %v449_v42 = vmul.f32 %v664_v17, %v406_v12 }
  0x18   : > { %680 = vst [vmem:[%s803_s24 + $0x40] sm:$0xff] %v457_v20  ;;  %681 = vst [vmem:[%s803_s24 + $0x48] sm:$0xff] %v458_v21  ;;  %v450_v43 = vmul.f32 %v665_v19, %v407_v13  ;;  %v451_v45 = vmul.f32 %v666_v23, %v408_v14  ;;  %v452_v47 = vmul.f32 %v667_v25, %v409_v15 }
  0x19   : > { %v424_v22 = vmax.f32 %v422_v16, %v423_v18  ;;  %682 = vst [vmem:[%s803_s24 + $0x50] sm:$0xff] %v459_v24  ;;  %683 = vst [vmem:[%s803_s24 + $0x58] sm:$0xff] %v460_v30 }
  0x1a   : > { %v453_v44 = vadd.f32 %v450_v43, %v449_v42 }
  0x1b   : > { %v425_v26 = vsub.f32 %v406_v12, %v424_v22  ;;  %v426_v27 = vsub.f32 %v407_v13, %v424_v22  ;;  %v427_v28 = vsub.f32 %v408_v14, %v424_v22  ;;  %v428_v29 = vsub.f32 %v409_v15, %v424_v22 }
  0x1c   : > { %v454_v48 = vadd.f32 %v453_v44, %v451_v45 }
  0x1d   : > { %v429_v31 = vmul.f32 1.442695, %v425_v26  ;;  %v431_v32 = vmul.f32 1.442695, %v426_v27  ;;  %v433_v33 = vmul.f32 1.442695, %v427_v28 }
  0x1e   : > { %v435_v34 = vmul.f32 1.442695, %v428_v29  ;;  %v455_v60 = vadd.f32 %v454_v48, %v452_v47 }
  0x1f   : > { %715 = vpow2.f32 %v429_v31 }
  0x20   : > { %717 = vpow2.f32 %v431_v32 }
  0x21   : > { %719 = vpow2.f32 %v433_v33 }
  0x22   : > { %721 = vpow2.f32 %v435_v34 }
  0x2c   : > { %v716_v35 = vpop.eup %715 }
  0x2d   : > { %v718_v36 = vpop.eup %717 }
  0x2e   : > { %v720_v37 = vpop.eup %719  ;;  %v437_v38 = vadd.f32 %v718_v36, %v716_v35 }
  0x2f   : > { %v722_v39 = vpop.eup %721 }
  0x30   : > { %v438_v40 = vadd.f32 %v720_v37, %v437_v38 }
  0x32   : > { %v439_v41 = vadd.f32 %v722_v39, %v438_v40 }
  0x34   : > { %723 = vrcp.f32 %v439_v41 }
  0x35   : > { %725 = vlog2.f32 %v439_v41 }
  0x41   : > { %v724_v46 = vpop.eup %723 }
  0x42   : > { %v726_v49 = vpop.eup %725  ;;  %v442_v50 = vmul.f32 %v724_v46, %v716_v35  ;;  %v443_v51 = vmul.f32 %v724_v46, %v718_v36  ;;  %v444_v52 = vmul.f32 %v724_v46, %v720_v37  ;;  %v445_v53 = vmul.f32 %v724_v46, %v722_v39 }
  0x43   : > { %v447_v54 = vmul.f32 0.6931472, %v726_v49 }
  0x44   : > { %v461_v55 = vmul.f32 %v796_v11, %v442_v50  ;;  %v462_v56 = vmul.f32 %v796_v11, %v443_v51  ;;  %v463_v57 = vmul.f32 %v796_v11, %v444_v52  ;;  %v464_v58 = vmul.f32 %v796_v11, %v445_v53 }
  0x45   : > { %v448_v59 = vadd.f32 %v447_v54, %v424_v22 }
  0x46   : > { %v470_v61 = vmul.f32 %v461_v55, %v457_v20  ;;  %v471_v62 = vmul.f32 %v462_v56, %v458_v21  ;;  %v472_v63 = vmul.f32 %v463_v57, %v459_v24  ;;  %v473_v0 = vmul.f32 %v464_v58, %v460_v30  ;;  %672 = vst [vmem:[%s803_s24 + $0x20] sm:$0xff] %v461_v55 }
  0x47   : > { %673 = vst [vmem:[%s803_s24 + $0x28] sm:$0xff] %v462_v56  ;;  %674 = vst [vmem:[%s803_s24 + $0x30] sm:$0xff] %v463_v57  ;;  %v456_v1 = vsub.f32 %v448_v59, %v455_v60 }
  0x48   : > { %675 = vst [vmem:[%s803_s24 + $0x38] sm:$0xff] %v464_v58  ;;  %482 = vst [vmem:[%s803_s24] sm:$0xff] %v470_v61 }
  0x49   : > { %483 = vst [vmem:[%s803_s24 + $0x8] sm:$0xff] %v471_v62  ;;  %484 = vst [vmem:[%s803_s24 + $0x10] sm:$0xff] %v472_v63  ;;  %v465_v2 = vmul.f32 %v796_v11, %v456_v1 }
  0x4a   : > { %485 = vst [vmem:[%s803_s24 + $0x18] sm:$0xff] %v473_v0 }
  0x4b   : > { %685 = vst [vmem:[%s803_s24 + $0x60] sm:$0xff] %v465_v2 }
  0x4c PF: > { %s12_s11 = sadd.s32 1, %s749_s11   ;;  %s837_s9 = smov %s745_s10 }
  0x4d   : > { %p9_p5 = scmp.ge.s32.totalorder %s12_s11, 4   ;;  %s838_s10 = smov %s840_s12 }
  0x4f   :  { %11 = sbr.rel (!%p9_p5) target bundleno = 2 (0x2), region = 79 }

</bundles_post_ra>
